<compile_context>
chip_gen: v7x
topology: tpu7x:2x2x1
jax: 0.10.0
libtpu: 0.0.40
codegen_flags: <defaults>
</compile_context>

<pallas_src>
import functools

import jax
import jax.numpy as jnp
from jax import lax
from jax.experimental import pallas as pl
from jax.experimental.pallas import tpu as pltpu

K_IN = 101     # 100-dim noise + 1-dim condition
H1 = 256
H2 = 256
OUT = 784

K_PAD = 128    # 101 -> 128: lane-dense x loads / MXU K dim


def _round_up(n, m):
    return ((n + m - 1) // m) * m


def _mlp_chunk(x, w1_ref, b1_ref, w2_ref, b2_ref, w3_ref, b3_ref):
    """One (chunk, K_PAD) row-slice through the 3-layer MLP.
    bf16 operands, f32 MXU accumulation, f32 bias/ReLU/tanh epilogue."""
    h = jnp.dot(x, w1_ref[...], preferred_element_type=jnp.float32)
    h = jnp.maximum(h + b1_ref[...], 0.0)
    h = jnp.dot(h.astype(w2_ref.dtype), w2_ref[...], preferred_element_type=jnp.float32)
    h = jnp.maximum(h + b2_ref[...], 0.0)
    h = jnp.dot(h.astype(w3_ref.dtype), w3_ref[...], preferred_element_type=jnp.float32)
    return jnp.tanh(h + b3_ref[...])


def _make_gen_kernel(tm, chunk):
    n_chunks = tm // chunk
    assert n_chunks * chunk == tm

    def kernel(x_ref, w1_ref, b1_ref, w2_ref, b2_ref, w3_ref, b3_ref, o_ref):
        if n_chunks == 1:
            o_ref[...] = _mlp_chunk(
                x_ref[...], w1_ref, b1_ref, w2_ref, b2_ref, w3_ref, b3_ref
            ).astype(o_ref.dtype)
            return

        def body(c, carry):
            r = pl.multiple_of(c * chunk, chunk)
            xc = x_ref[pl.ds(r, chunk), :]
            yc = _mlp_chunk(xc, w1_ref, b1_ref, w2_ref, b2_ref, w3_ref, b3_ref)
            o_ref[pl.ds(r, chunk), :] = yc.astype(o_ref.dtype)
            return carry

        # Unrolled so the LLO scheduler can overlap chunk i's MXU work with
        # chunk i-1's VPU/EUP epilogue and VMEM stores.
        lax.fori_loop(0, n_chunks, body, 0, unroll=True)

    return kernel


def prepare_params(params):
    """One-time weight prep (hoisted out of the forward): pad K 101->128,
    cast weights to bf16 for the MXU, keep biases f32 for the epilogue."""
    return {
        "w1": jnp.pad(params["w1"], ((0, K_PAD - K_IN), (0, 0))).astype(jnp.bfloat16),
        "b1": params["b1"].reshape(1, H1).astype(jnp.float32),
        "w2": params["w2"].astype(jnp.bfloat16),
        "b2": params["b2"].reshape(1, H2).astype(jnp.float32),
        "w3": params["w3"].astype(jnp.bfloat16),
        "b3": params["b3"].reshape(1, OUT).astype(jnp.float32),
    }


def _pick_tm(batch, tm_max):
    b16 = max(16, _round_up(batch, 16))
    if b16 >= 2 * tm_max:
        return tm_max
    if b16 >= 256:
        # Two grid steps: small row padding, and the "parallel" batch axis can
        # shard across both TensorCores on v7x.
        return _round_up((b16 + 1) // 2, 16)
    return b16


@functools.partial(jax.jit, static_argnames=("tm", "out_dtype"))
def generator_forward(x, prepped, tm=512, out_dtype=jnp.float32):
    """x: (B, 101) f32, prepped = prepare_params(...) -> (B, 784) out_dtype."""
    B = x.shape[0]
    TM = _pick_tm(B, tm)
    B_pad = _round_up(B, TM)
    chunk = 128 if (TM % 128 == 0 and TM >= 256) else TM

    xp = jnp.pad(x, ((0, B_pad - B), (0, K_PAD - K_IN))).astype(jnp.bfloat16)

    w1, b1 = prepped["w1"], prepped["b1"]
    w2, b2 = prepped["w2"], prepped["b2"]
    w3, b3 = prepped["w3"], prepped["b3"]

    # Weights/biases: constant block index -> DMA'd once, resident across grid steps.
    resident = lambda arr: pl.BlockSpec(arr.shape, lambda i: (0, 0))

    out = pl.pallas_call(
        _make_gen_kernel(TM, chunk),
        out_shape=jax.ShapeDtypeStruct((B_pad, OUT), out_dtype),
        grid=(B_pad // TM,),
        in_specs=[
            pl.BlockSpec((TM, K_PAD), lambda i: (i, 0)),   # x tile (pipelined)
            resident(w1), resident(b1),
            resident(w2), resident(b2),
            resident(w3), resident(b3),
        ],
        # Full last dim (784) -> legal block shape; no 896 pad, no lane-slice copy.
        out_specs=pl.BlockSpec((TM, OUT), lambda i: (i, 0)),
        compiler_params=pltpu.CompilerParams(
            dimension_semantics=("parallel",),
            vmem_limit_bytes=16 << 20,
        ),
    )(xp, w1, b1, w2, b2, w3, b3)

    if B_pad != B:
        out = out[:B]
    return out


def init_params(key):
    """Deterministic synthetic init matching nn.Linear shapes (stored as (in, out))."""
    ks = jax.random.split(key, 6)

    def linear(kw, kb, fan_in, fan_out):
        bound = 1.0 / jnp.sqrt(jnp.float32(fan_in))
        w = jax.random.uniform(kw, (fan_in, fan_out), jnp.float32, -bound, bound)
        b = jax.random.uniform(kb, (1, fan_out), jnp.float32, -bound, bound)
        return w, b

    w1, b1 = linear(ks[0], ks[1], K_IN, H1)
    w2, b2 = linear(ks[2], ks[3], H1, H2)
    w3, b3 = linear(ks[4], ks[5], H2, OUT)
    return {"w1": w1, "b1": b1, "w2": w2, "b2": b2, "w3": w3, "b3": b3}


def reference_forward_f32(x, p):
    h = jnp.maximum(x @ p["w1"] + p["b1"], 0.0)
    h = jnp.maximum(h @ p["w2"] + p["b2"], 0.0)
    return jnp.tanh(h @ p["w3"] + p["b3"])


def reference_forward_bf16(x, p):
    """Mirrors the kernel's bf16-operand / f32-accumulate path."""
    bf = jnp.bfloat16
    h = jnp.dot(x.astype(bf), p["w1"].astype(bf), preferred_element_type=jnp.float32) + p["b1"]
    h = jnp.maximum(h, 0.0)
    h = jnp.dot(h.astype(bf), p["w2"].astype(bf), preferred_element_type=jnp.float32) + p["b2"]
    h = jnp.maximum(h, 0.0)
    h = jnp.dot(h.astype(bf), p["w3"].astype(bf), preferred_element_type=jnp.float32) + p["b3"]
    return jnp.tanh(h)


if __name__ == "__main__":
    key = jax.random.PRNGKey(0)
    k_x, k_p = jax.random.split(key)
    params = init_params(k_p)
    prepped = prepare_params(params)   # weight pad/cast done once, reused below

    # Tiny batch: single grid step, rows padded 8 -> 16.
    x_small = jax.random.normal(k_x, (8, K_IN), jnp.float32)
    out_small = jax.block_until_ready(generator_forward(x_small, prepped))
    assert out_small.shape == (8, OUT), out_small.shape
    err_bf16 = float(jnp.max(jnp.abs(out_small - reference_forward_bf16(x_small, params))))
    err_f32 = float(jnp.max(jnp.abs(out_small - reference_forward_f32(x_small, params))))
    assert err_bf16 < 1e-2, err_bf16
    assert err_f32 < 5e-2, err_f32

    # Non-multiple batch: 2-step grid (TM=160) + row-padding path.
    x_mid = jax.random.normal(jax.random.PRNGKey(1), (300, K_IN), jnp.float32)
    out_mid = jax.block_until_ready(generator_forward(x_mid, prepped))
    assert out_mid.shape == (300, OUT), out_mid.shape
    err_mid = float(jnp.max(jnp.abs(out_mid - reference_forward_bf16(x_mid, params))))
    assert err_mid < 1e-2, err_mid

    # Larger batch: TM=512 tiles with 128-row in-kernel chunking (epilogue overlap).
    x_big = jax.random.normal(jax.random.PRNGKey(2), (1024, K_IN), jnp.float32)
    out_big = jax.block_until_ready(generator_forward(x_big, prepped))
    assert out_big.shape == (1024, OUT), out_big.shape
    err_big = float(jnp.max(jnp.abs(out_big - reference_forward_bf16(x_big, params))))
    assert err_big < 1e-2, err_big

    print("KERNEL_OK")
</pallas_src>

<mosaic_0001>
module attributes {stable_mosaic.version = 11 : i64} {
  func.func @kernel(%arg0: i32, %arg1: memref<16x128xbf16, #tpu.memory_space<vmem>>, %arg2: memref<128x256xbf16, #tpu.memory_space<vmem>>, %arg3: memref<1x256xf32, #tpu.memory_space<vmem>>, %arg4: memref<256x256xbf16, #tpu.memory_space<vmem>>, %arg5: memref<1x256xf32, #tpu.memory_space<vmem>>, %arg6: memref<256x784xbf16, #tpu.memory_space<vmem>>, %arg7: memref<1x784xf32, #tpu.memory_space<vmem>>, %arg8: memref<16x784xf32, #tpu.memory_space<vmem>>) attributes {dimension_semantics = [#tpu.dimension_semantics<parallel>], iteration_bounds = array<i64: 1>, scalar_prefetch = 0 : i64, scratch_operands = 0 : i64, tpu.core_type = #tpu.core_type<tc>, window_params = [{transform_indices = @transform_0, window_bounds = array<i64: 16, 128>}, {pipeline_mode = #tpu.pipeline_mode<synchronous>, transform_indices = @transform_1, window_bounds = array<i64: 128, 256>}, {pipeline_mode = #tpu.pipeline_mode<synchronous>, transform_indices = @transform_2, window_bounds = array<i64: 1, 256>}, {pipeline_mode = #tpu.pipeline_mode<synchronous>, transform_indices = @transform_3, window_bounds = array<i64: 256, 256>}, {pipeline_mode = #tpu.pipeline_mode<synchronous>, transform_indices = @transform_4, window_bounds = array<i64: 1, 256>}, {pipeline_mode = #tpu.pipeline_mode<synchronous>, transform_indices = @transform_5, window_bounds = array<i64: 256, 784>}, {pipeline_mode = #tpu.pipeline_mode<synchronous>, transform_indices = @transform_6, window_bounds = array<i64: 1, 784>}, {transform_indices = @transform_7, window_bounds = array<i64: 16, 784>}]} {
    %c0 = arith.constant 0 : index
    %c0_0 = arith.constant 0 : index
    %0 = vector.load %arg1[%c0, %c0_0] : memref<16x128xbf16, #tpu.memory_space<vmem>>, vector<16x128xbf16>
    %c0_1 = arith.constant 0 : index
    %c0_2 = arith.constant 0 : index
    %1 = vector.load %arg2[%c0_1, %c0_2] : memref<128x256xbf16, #tpu.memory_space<vmem>>, vector<128x256xbf16>
    %cst = arith.constant dense<0.000000e+00> : vector<16x256xf32>
    %2 = tpu.matmul %0, %1, %cst {dimension_numbers = #tpu.dot_dimension_numbers<[1], [0], [0], [1], [0, 0, 1, 1], [], []>} : vector<16x128xbf16>, vector<128x256xbf16>, vector<16x256xf32> -> vector<16x256xf32>
    %c0_3 = arith.constant 0 : index
    %c0_4 = arith.constant 0 : index
    %3 = vector.load %arg3[%c0_3, %c0_4] : memref<1x256xf32, #tpu.memory_space<vmem>>, vector<1x256xf32>
    %4 = vector.broadcast %3 : vector<1x256xf32> to vector<16x256xf32>
    %5 = arith.addf %2, %4 : vector<16x256xf32>
    %cst_5 = arith.constant 0.000000e+00 : f32
    %6 = vector.broadcast %cst_5 : f32 to vector<16x256xf32>
    %7 = arith.maximumf %5, %6 : vector<16x256xf32>
    %8 = arith.truncf %7 : vector<16x256xf32> to vector<16x256xbf16>
    %c0_6 = arith.constant 0 : index
    %c0_7 = arith.constant 0 : index
    %9 = vector.load %arg4[%c0_6, %c0_7] : memref<256x256xbf16, #tpu.memory_space<vmem>>, vector<256x256xbf16>
    %cst_8 = arith.constant dense<0.000000e+00> : vector<16x256xf32>
    %10 = tpu.matmul %8, %9, %cst_8 {dimension_numbers = #tpu.dot_dimension_numbers<[1], [0], [0], [1], [0, 0, 1, 1], [], []>} : vector<16x256xbf16>, vector<256x256xbf16>, vector<16x256xf32> -> vector<16x256xf32>
    %c0_9 = arith.constant 0 : index
    %c0_10 = arith.constant 0 : index
    %11 = vector.load %arg5[%c0_9, %c0_10] : memref<1x256xf32, #tpu.memory_space<vmem>>, vector<1x256xf32>
    %12 = vector.broadcast %11 : vector<1x256xf32> to vector<16x256xf32>
    %13 = arith.addf %10, %12 : vector<16x256xf32>
    %cst_11 = arith.constant 0.000000e+00 : f32
    %14 = vector.broadcast %cst_11 : f32 to vector<16x256xf32>
    %15 = arith.maximumf %13, %14 : vector<16x256xf32>
    %16 = arith.truncf %15 : vector<16x256xf32> to vector<16x256xbf16>
    %c0_12 = arith.constant 0 : index
    %c0_13 = arith.constant 0 : index
    %17 = vector.load %arg6[%c0_12, %c0_13] : memref<256x784xbf16, #tpu.memory_space<vmem>>, vector<256x784xbf16>
    %cst_14 = arith.constant dense<0.000000e+00> : vector<16x784xf32>
    %18 = tpu.matmul %16, %17, %cst_14 {dimension_numbers = #tpu.dot_dimension_numbers<[1], [0], [0], [1], [0, 0, 1, 1], [], []>} : vector<16x256xbf16>, vector<256x784xbf16>, vector<16x784xf32> -> vector<16x784xf32>
    %c0_15 = arith.constant 0 : index
    %c0_16 = arith.constant 0 : index
    %19 = vector.load %arg7[%c0_15, %c0_16] : memref<1x784xf32, #tpu.memory_space<vmem>>, vector<1x784xf32>
    %20 = vector.broadcast %19 : vector<1x784xf32> to vector<16x784xf32>
    %21 = arith.addf %18, %20 : vector<16x784xf32>
    %22 = math.tanh %21 : vector<16x784xf32>
    %c0_17 = arith.constant 0 : index
    %c0_18 = arith.constant 0 : index
    %23 = vector.load %arg8[%c0_17, %c0_18] : memref<16x784xf32, #tpu.memory_space<vmem>>, vector<16x784xf32>
    tpu.vector_store %arg8[%c0_17, %c0_18], %22 {strides = array<i32>} : memref<16x784xf32, #tpu.memory_space<vmem>>, vector<16x784xf32>,
    return
  }
  func.func @transform_0(%arg0: i32) -> (i32, i32) {
    %c0_i32 = arith.constant 0 : i32
    %c0_i32_0 = arith.constant 0 : i32
    return %arg0, %c0_i32 : i32, i32
  }
  func.func @transform_1(%arg0: i32) -> (i32, i32) {
    %c0_i32 = arith.constant 0 : i32
    %c0_i32_0 = arith.constant 0 : i32
    %c0_i32_1 = arith.constant 0 : i32
    return %c0_i32, %c0_i32_0 : i32, i32
  }
  func.func @transform_2(%arg0: i32) -> (i32, i32) {
    %c0_i32 = arith.constant 0 : i32
    %c0_i32_0 = arith.constant 0 : i32
    %c0_i32_1 = arith.constant 0 : i32
    return %c0_i32, %c0_i32_0 : i32, i32
  }
  func.func @transform_3(%arg0: i32) -> (i32, i32) {
    %c0_i32 = arith.constant 0 : i32
    %c0_i32_0 = arith.constant 0 : i32
    %c0_i32_1 = arith.constant 0 : i32
    return %c0_i32, %c0_i32_0 : i32, i32
  }
  func.func @transform_4(%arg0: i32) -> (i32, i32) {
    %c0_i32 = arith.constant 0 : i32
    %c0_i32_0 = arith.constant 0 : i32
    %c0_i32_1 = arith.constant 0 : i32
    return %c0_i32, %c0_i32_0 : i32, i32
  }
  func.func @transform_5(%arg0: i32) -> (i32, i32) {
    %c0_i32 = arith.constant 0 : i32
    %c0_i32_0 = arith.constant 0 : i32
    %c0_i32_1 = arith.constant 0 : i32
    return %c0_i32, %c0_i32_0 : i32, i32
  }
  func.func @transform_6(%arg0: i32) -> (i32, i32) {
    %c0_i32 = arith.constant 0 : i32
    %c0_i32_0 = arith.constant 0 : i32
    %c0_i32_1 = arith.constant 0 : i32
    return %c0_i32, %c0_i32_0 : i32, i32
  }
  func.func @transform_7(%arg0: i32) -> (i32, i32) {
    %c0_i32 = arith.constant 0 : i32
    %c0_i32_0 = arith.constant 0 : i32
    return %arg0, %c0_i32 : i32, i32
  }
}

</mosaic_0001>

<bundles_post_ra>
// kernel: generator_forward.1
= control target key start
LH: loop header
LB: loop body
LE: loop exit
PB: predicated region body
PF: predicated region fallthrough
CT: control target
= control target key end

     0   :  { %v1834_v1 = vmov 0   ;;  %vm1376_vm0 = vcmask 130048   ;;  %s2443_s1 = inlined_call_operand.vmem [shape: bf16[128,256], index: 1, kind: input, shape index: {}]   ;;  %s2444_s0 = inlined_call_operand.vmem [shape: bf16[16,128], index: 0, kind: input, shape index: {}]   ;;  %s2445_s3 = inlined_call_operand.vmem [shape: bf16[256,256], index: 3, kind: input, shape index: {}]   ;;  %s2446_s5 = inlined_call_operand.vmem [shape: bf16[256,784], index: 5, kind: input, shape index: {}]   ;;  %s2447_s2 = inlined_call_operand.vmem [shape: f32[1,256], index: 2, kind: input, shape index: {}]   ;;  %s2448_s4 = inlined_call_operand.vmem [shape: f32[1,256], index: 4, kind: input, shape index: {}]   ;;  %s2449_s6 = inlined_call_operand.vmem [shape: f32[1,784], index: 6, kind: input, shape index: {}]   ;;  %s2450_s7 = inlined_call_operand.vmem [shape: f32[16,784], index: 7, kind: output, shape index: {}]  }
   0x1   :  { %v1573_v0 = vld [vmem:[%s2443_s1 + $0x4] ss:$8 sps:$4 sm:$0xff]   ;;  %175 = vmatprep.mubr.bf16.mxu0 %v1834_v1  ;;  %v1575_v2 = vld [vmem:[%s2443_s1] ss:$8 sps:$4 sm:$0xff]   ;;  %v1576_v3 = vld [vmem:[%s2443_s1 + $0x14] ss:$8 sps:$4 sm:$0xff]  }
   0x2   :  { %143 = vmatprep.subr.bf16.mxu0 %v1573_v0  ;;  %v1578_v4 = vld [vmem:[%s2443_s1 + $0x10] ss:$8 sps:$4 sm:$0xff]   ;;  %v1579_v5 = vld [vmem:[%s2443_s1 + $0x24] ss:$8 sps:$4 sm:$0xff]   ;;  %v1581_v6 = vld [vmem:[%s2443_s1 + $0x20] ss:$8 sps:$4 sm:$0xff]  }
   0x3   :  { %144 = vmatpush1.bf16.msra.mxu0 %v1575_v2  ;;  %v1582_v7 = vld [vmem:[%s2443_s1 + $0x34] ss:$8 sps:$4 sm:$0xff]   ;;  %v1584_v8 = vld [vmem:[%s2443_s1 + $0x30] ss:$8 sps:$4 sm:$0xff]   ;;  %v1585_v9 = vld [vmem:[%s2443_s1 + $0x44] ss:$8 sps:$4 sm:$0xff]  }
   0x4   :  { %145 = vmatprep.subr.bf16.mxu0 %v1576_v3  ;;  %v1598_v10 = vld [vmem:[%s2445_s3 + $0x4] ss:$8 sps:$4 sm:$0xff]   ;;  %v1600_v11 = vld [vmem:[%s2445_s3] ss:$8 sps:$4 sm:$0xff]   ;;  %v1601_v12 = vld [vmem:[%s2445_s3 + $0x14] ss:$8 sps:$4 sm:$0xff]  }
   0x5   :  { %396 = vmatprep.subr.bf16.mxu1 %v1598_v10  ;;  %v1587_v13 = vld [vmem:[%s2443_s1 + $0x40] ss:$8 sps:$4 sm:$0xff]   ;;  %v1603_v14 = vld [vmem:[%s2445_s3 + $0x10] ss:$8 sps:$4 sm:$0xff]   ;;  %v1588_v15 = vld [vmem:[%s2443_s1 + $0x54] ss:$8 sps:$4 sm:$0xff]  }
   0x6   :  { %397 = vmatpush1.bf16.msra.mxu1 %v1600_v11  ;;  %v1604_v16 = vld [vmem:[%s2445_s3 + $0x24] ss:$8 sps:$4 sm:$0xff]   ;;  %v1590_v17 = vld [vmem:[%s2443_s1 + $0x50] ss:$8 sps:$4 sm:$0xff]   ;;  %v1606_v18 = vld [vmem:[%s2445_s3 + $0x20] ss:$8 sps:$4 sm:$0xff]  }
   0x7   :  { %146 = vmatpush1.bf16.msra.mxu0 %v1578_v4  ;;  %398 = vmatprep.subr.bf16.mxu1 %v1601_v12  ;;  %v1591_v19 = vld [vmem:[%s2443_s1 + $0x64] ss:$8 sps:$4 sm:$0xff]   ;;  %v1607_v20 = vld [vmem:[%s2445_s3 + $0x34] ss:$8 sps:$4 sm:$0xff]   ;;  %v1593_v21 = vld [vmem:[%s2443_s1 + $0x60] ss:$8 sps:$4 sm:$0xff]  }
   0x8   :  { %147 = vmatprep.subr.bf16.mxu0 %v1579_v5  ;;  %v1609_v22 = vld [vmem:[%s2445_s3 + $0x30] ss:$8 sps:$4 sm:$0xff]   ;;  %v1594_v23 = vld [vmem:[%s2443_s1 + $0x74] ss:$8 sps:$4 sm:$0xff]   ;;  %v1610_v24 = vld [vmem:[%s2445_s3 + $0x44] ss:$8 sps:$4 sm:$0xff]  }
   0x9   :  { %v1596_v25 = vld [vmem:[%s2443_s1 + $0x70] ss:$8 sps:$4 sm:$0xff]   ;;  %v1612_v26 = vld [vmem:[%s2445_s3 + $0x40] ss:$8 sps:$4 sm:$0xff]   ;;  %v1613_v27 = vld [vmem:[%s2445_s3 + $0x54] ss:$8 sps:$4 sm:$0xff]  }
   0xa   :  { %399 = vmatpush1.bf16.msra.mxu1 %v1603_v14  ;;  %v1597_v28 = vld [vmem:[%s2444_s0] sm:$0xff]   ;;  %v1615_v29 = vld [vmem:[%s2445_s3 + $0x50] ss:$8 sps:$4 sm:$0xff]   ;;  %v1619_v32 = vld [vmem:[%s2445_s3 + $0x74] ss:$8 sps:$4 sm:$0xff]  }
   0xb   :  { %148 = vmatpush1.bf16.msra.mxu0 %v1581_v6  ;;  %400 = vmatprep.subr.bf16.mxu1 %v1604_v16  ;;  %v1616_v30 = vld [vmem:[%s2445_s3 + $0x64] ss:$8 sps:$4 sm:$0xff]   ;;  %v1618_v31 = vld [vmem:[%s2445_s3 + $0x60] ss:$8 sps:$4 sm:$0xff]   ;;  %v1621_v33 = vld [vmem:[%s2445_s3 + $0x70] ss:$8 sps:$4 sm:$0xff]  }
   0xc   :  { %149 = vmatprep.subr.bf16.mxu0 %v1582_v7  ;;  %v1622_v34 = vld [vmem:[%s2445_s3 + $0x84] ss:$8 sps:$4 sm:$0xff]   ;;  %v1624_v35 = vld [vmem:[%s2445_s3 + $0x80] ss:$8 sps:$4 sm:$0xff]   ;;  %v1625_v36 = vld [vmem:[%s2445_s3 + $0x94] ss:$8 sps:$4 sm:$0xff]  }
   0xd   :  { %v1627_v37 = vld [vmem:[%s2445_s3 + $0x90] ss:$8 sps:$4 sm:$0xff]   ;;  %v1628_v38 = vld [vmem:[%s2445_s3 + $0xa4] ss:$8 sps:$4 sm:$0xff]   ;;  %v1630_v39 = vld [vmem:[%s2445_s3 + $0xa0] ss:$8 sps:$4 sm:$0xff]  }
   0xe   :  { %401 = vmatpush1.bf16.msra.mxu1 %v1606_v18  ;;  %v1631_v40 = vld [vmem:[%s2445_s3 + $0xb4] ss:$8 sps:$4 sm:$0xff]   ;;  %v1633_v41 = vld [vmem:[%s2445_s3 + $0xb0] ss:$8 sps:$4 sm:$0xff]   ;;  %v1634_v42 = vld [vmem:[%s2445_s3 + $0xc4] ss:$8 sps:$4 sm:$0xff]  }
   0xf   :  { %150 = vmatpush1.bf16.msra.mxu0 %v1584_v8  ;;  %402 = vmatprep.subr.bf16.mxu1 %v1607_v20  ;;  %v1636_v43 = vld [vmem:[%s2445_s3 + $0xc0] ss:$8 sps:$4 sm:$0xff]   ;;  %v1637_v44 = vld [vmem:[%s2445_s3 + $0xd4] ss:$8 sps:$4 sm:$0xff]   ;;  %v1639_v45 = vld [vmem:[%s2445_s3 + $0xd0] ss:$8 sps:$4 sm:$0xff]  }
  0x10   :  { %151 = vmatprep.subr.bf16.mxu0 %v1585_v9  ;;  %v1640_v46 = vld [vmem:[%s2445_s3 + $0xe4] ss:$8 sps:$4 sm:$0xff]   ;;  %v1642_v47 = vld [vmem:[%s2445_s3 + $0xe0] ss:$8 sps:$4 sm:$0xff]   ;;  %v1643_v48 = vld [vmem:[%s2445_s3 + $0xf4] ss:$8 sps:$4 sm:$0xff]  }
  0x11   :  { %v1645_v49 = vld [vmem:[%s2445_s3 + $0xf0] ss:$8 sps:$4 sm:$0xff]   ;;  %v1646_v50 = vld [vmem:[%s2446_s5] ss:$28 sps:$4 sm:$0xff]   ;;  %v1651_v52 = vld [vmem:[%s2446_s5 + $0xc] ss:$28 sps:$4 sm:$0xff]  }
  0x12   :  { %403 = vmatpush1.bf16.msra.mxu1 %v1609_v22  ;;  %v1648_v51 = vld [vmem:[%s2446_s5 + $0x4] ss:$28 sps:$4 sm:$0xff]   ;;  %v1654_v53 = vld [vmem:[%s2446_s5 + $0x3c] ss:$28 sps:$4 sm:$0xff]   ;;  %v1660_v55 = vld [vmem:[%s2446_s5 + $0x74] ss:$28 sps:$4 sm:$0xff]  }
  0x13   :  { %152 = vmatpush1.bf16.msra.mxu0 %v1587_v13  ;;  %404 = vmatprep.subr.bf16.mxu1 %v1610_v24  ;;  %v1652_v54 = vld [vmem:[%s2446_s5 + $0x38] ss:$28 sps:$4 sm:$0xff]   ;;  %v1658_v56 = vld [vmem:[%s2446_s5 + $0x70] ss:$28 sps:$4 sm:$0xff]   ;;  %v1664_v58 = vld [vmem:[%s2446_s5 + $0xa8] ss:$28 sps:$4 sm:$0xff]  }
  0x14   :  { %153 = vmatprep.subr.bf16.mxu0 %v1588_v15  ;;  %v1666_v57 = vld [vmem:[%s2446_s5 + $0xac] ss:$28 sps:$4 sm:$0xff]   ;;  %v1672_v59 = vld [vmem:[%s2446_s5 + $0xe4] ss:$28 sps:$4 sm:$0xff]   ;;  %v1678_v61 = vld [vmem:[%s2446_s5 + $0x11c] ss:$28 sps:$4 sm:$0xff]   ;;  %v47_v15 = vlaneseq }
  0x15   :  { %v1670_v60 = vld [vmem:[%s2446_s5 + $0xe0] ss:$28 sps:$4 sm:$0xff]   ;;  %v1676_v62 = vld [vmem:[%s2446_s5 + $0x118] ss:$28 sps:$4 sm:$0xff]   ;;  %v1682_v0 = vld [vmem:[%s2446_s5 + $0x150] ss:$28 sps:$4 sm:$0xff]  }
  0x16   :  { %405 = vmatpush1.bf16.msra.mxu1 %v1612_v26  ;;  %v1684_v63 = vld [vmem:[%s2446_s5 + $0x154] ss:$28 sps:$4 sm:$0xff]   ;;  %v1690_v1 = vld [vmem:[%s2446_s5 + $0x18c] ss:$28 sps:$4 sm:$0xff]   ;;  %v1696_v3 = vld [vmem:[%s2446_s5 + $0x1c4] ss:$28 sps:$4 sm:$0xff]  }
  0x17   :  { %154 = vmatpush1.bf16.msra.mxu0 %v1590_v17  ;;  %406 = vmatprep.subr.bf16.mxu1 %v1613_v27  ;;  %v1688_v2 = vld [vmem:[%s2446_s5 + $0x188] ss:$28 sps:$4 sm:$0xff]   ;;  %v1694_v4 = vld [vmem:[%s2446_s5 + $0x1c0] ss:$28 sps:$4 sm:$0xff]   ;;  %v1700_v6 = vld [vmem:[%s2446_s5 + $0x1f8] ss:$28 sps:$4 sm:$0xff]  }
  0x18   :  { %155 = vmatprep.subr.bf16.mxu0 %v1591_v19  ;;  %v1702_v5 = vld [vmem:[%s2446_s5 + $0x1fc] ss:$28 sps:$4 sm:$0xff]   ;;  %v1708_v7 = vld [vmem:[%s2446_s5 + $0x234] ss:$28 sps:$4 sm:$0xff]   ;;  %v1714_v9 = vld [vmem:[%s2446_s5 + $0x26c] ss:$28 sps:$4 sm:$0xff]  }
  0x19   :  { %v1706_v8 = vld [vmem:[%s2446_s5 + $0x230] ss:$28 sps:$4 sm:$0xff]   ;;  %v1712_v10 = vld [vmem:[%s2446_s5 + $0x268] ss:$28 sps:$4 sm:$0xff]   ;;  %v1718_v12 = vld [vmem:[%s2446_s5 + $0x2a0] ss:$28 sps:$4 sm:$0xff]  }
  0x1a   :  { %407 = vmatpush1.bf16.msra.mxu1 %v1615_v29  ;;  %v1720_v11 = vld [vmem:[%s2446_s5 + $0x2a4] ss:$28 sps:$4 sm:$0xff]   ;;  %v1726_v13 = vld [vmem:[%s2446_s5 + $0x2dc] ss:$28 sps:$4 sm:$0xff]   ;;  %v2109_v16 = vshrl.u32 %v47_v15, 7 }
  0x1b   :  { %156 = vmatpush1.bf16.msra.mxu0 %v1593_v21  ;;  %408 = vmatprep.subr.bf16.mxu1 %v1616_v30  ;;  %v1724_v14 = vld [vmem:[%s2446_s5 + $0x2d8] ss:$28 sps:$4 sm:$0xff]   ;;  %v45_v18 = vld [vmem:[%s2447_s2] sm:$0x3] }
  0x1c   :  { %157 = vmatprep.subr.bf16.mxu0 %v1594_v23  ;;  %v2112_v17 = vsub.s32 0, %v2109_v16  ;;  %v2118_v19 = vsub.s32 1, %v2109_v16 }
  0x1e   :  { %409 = vmatpush1.bf16.msra.mxu1 %v1618_v31  ;;  %v50_v20 = vrot.slane %v45_v18, %v2112_v17  ;;  %v54_v21 = vrot.slane %v45_v18, %v2118_v19 }
  0x1f   :  { %158 = vmatpush1.bf16.msra.mxu0 %v1596_v25  ;;  %410 = vmatprep.subr.bf16.mxu1 %v1619_v32 }
  0x20   :  { %1186 = vmatprep.subr.bf16.mxu0 %v1648_v51  ;;  %v1699_v51 = vld [vmem:[%s2446_s5 + $0x1cc] ss:$28 sps:$4 sm:$0xff]  }
  0x22   :  { %176 = vmatmul.mubr.bf16.vlgmr.msra.gmra.mrb[0].mxu0 %v1597_v28  ;;  %411 = vmatpush1.bf16.msra.mxu1 %v1621_v33 }
  0x23   :  { %412 = vmatprep.subr.bf16.mxu1 %v1622_v34  ;;  %1187 = vmatpush1.bf16.msra.mxu0 %v1646_v50  ;;  %v1691_v50 = vld [vmem:[%s2446_s5 + $0x190] ss:$28 sps:$4 sm:$0xff]  }
  0x24   :  { %1188 = vmatprep.subr.bf16.mxu0 %v1654_v53  ;;  %v1705_v53 = vld [vmem:[%s2446_s5 + $0x204] ss:$28 sps:$4 sm:$0xff]  }
  0x26   :  { %413 = vmatpush1.bf16.msra.mxu1 %v1624_v35 }
  0x27   :  { %414 = vmatprep.subr.bf16.mxu1 %v1625_v36  ;;  %1189 = vmatpush1.bf16.msra.mxu0 %v1652_v54  ;;  %v1649_v36 = vld [vmem:[%s2446_s5 + $0x8] ss:$28 sps:$4 sm:$0xff]   ;;  %v1703_v54 = vld [vmem:[%s2446_s5 + $0x200] ss:$28 sps:$4 sm:$0xff]  }
  0x28   :  { %1190 = vmatprep.subr.bf16.mxu0 %v1660_v55  ;;  %v1711_v55 = vld [vmem:[%s2446_s5 + $0x23c] ss:$28 sps:$4 sm:$0xff]  }
  0x2a   :  { %415 = vmatpush1.bf16.msra.mxu1 %v1627_v37  ;;  %v1657_v37 = vld [vmem:[%s2446_s5 + $0x44] ss:$28 sps:$4 sm:$0xff]  }
  0x2b   :  { %416 = vmatprep.subr.bf16.mxu1 %v1628_v38  ;;  %1191 = vmatpush1.bf16.msra.mxu0 %v1658_v56  ;;  %v1655_v38 = vld [vmem:[%s2446_s5 + $0x40] ss:$28 sps:$4 sm:$0xff]   ;;  %v1709_v56 = vld [vmem:[%s2446_s5 + $0x238] ss:$28 sps:$4 sm:$0xff]  }
  0x2c   :  { %1192 = vmatprep.subr.bf16.mxu0 %v1666_v57  ;;  %v1717_v57 = vld [vmem:[%s2446_s5 + $0x274] ss:$28 sps:$4 sm:$0xff]  }
  0x2e   :  { %417 = vmatpush1.bf16.msra.mxu1 %v1630_v39  ;;  %v1663_v39 = vld [vmem:[%s2446_s5 + $0x7c] ss:$28 sps:$4 sm:$0xff]  }
  0x2f   :  { %418 = vmatprep.subr.bf16.mxu1 %v1631_v40  ;;  %1193 = vmatpush1.bf16.msra.mxu0 %v1664_v58  ;;  %v1661_v40 = vld [vmem:[%s2446_s5 + $0x78] ss:$28 sps:$4 sm:$0xff]   ;;  %v1715_v58 = vld [vmem:[%s2446_s5 + $0x270] ss:$28 sps:$4 sm:$0xff]  }
  0x30   :  { %1194 = vmatprep.subr.bf16.mxu0 %v1672_v59  ;;  %v1723_v59 = vld [vmem:[%s2446_s5 + $0x2ac] ss:$28 sps:$4 sm:$0xff]  }
  0x32   :  { %419 = vmatpush1.bf16.msra.mxu1 %v1633_v41  ;;  %v1669_v41 = vld [vmem:[%s2446_s5 + $0xb4] ss:$28 sps:$4 sm:$0xff]  }
  0x33   :  { %420 = vmatprep.subr.bf16.mxu1 %v1634_v42  ;;  %1195 = vmatpush1.bf16.msra.mxu0 %v1670_v60  ;;  %v1667_v42 = vld [vmem:[%s2446_s5 + $0xb0] ss:$28 sps:$4 sm:$0xff]   ;;  %v1721_v60 = vld [vmem:[%s2446_s5 + $0x2a8] ss:$28 sps:$4 sm:$0xff]  }
  0x34   :  { %1196 = vmatprep.subr.bf16.mxu0 %v1678_v61  ;;  %v1729_v61 = vld [vmem:[%s2446_s5 + $0x2e4] ss:$28 sps:$4 sm:$0xff]  }
  0x36   :  { %421 = vmatpush1.bf16.msra.mxu1 %v1636_v43  ;;  %v1675_v43 = vld [vmem:[%s2446_s5 + $0xec] ss:$28 sps:$4 sm:$0xff]  }
  0x37   :  { %422 = vmatprep.subr.bf16.mxu1 %v1637_v44  ;;  %1197 = vmatpush1.bf16.msra.mxu0 %v1676_v62  ;;  %v1673_v44 = vld [vmem:[%s2446_s5 + $0xe8] ss:$28 sps:$4 sm:$0xff]   ;;  %v1727_v62 = vld [vmem:[%s2446_s5 + $0x2e0] ss:$28 sps:$4 sm:$0xff]  }
  0x38   :  { %1198 = vmatprep.subr.bf16.mxu0 %v1684_v63  ;;  %v1732_v63 = vld [vmem:[%s2446_s5 + $0x314] ss:$28 sps:$4 sm:$0xff]  }
  0x3a   :  { %423 = vmatpush1.bf16.msra.mxu1 %v1639_v45  ;;  %v1681_v45 = vld [vmem:[%s2446_s5 + $0x124] ss:$28 sps:$4 sm:$0xff]  }
  0x3b   :  { %424 = vmatprep.subr.bf16.mxu1 %v1640_v46  ;;  %1199 = vmatpush1.bf16.msra.mxu0 %v1682_v0  ;;  %v1679_v46 = vld [vmem:[%s2446_s5 + $0x120] ss:$28 sps:$4 sm:$0xff]  }
  0x3c   :  { %1200 = vmatprep.subr.bf16.mxu0 %v1690_v1  ;;  %v1735_v0 = vld [vmem:[%s2446_s5 + $0x31c] ss:$28 sps:$4 sm:$0xff]   ;;  %v1730_v1 = vld [vmem:[%s2446_s5 + $0x310] ss:$28 sps:$4 sm:$0xff]  }
  0x3e   :  { %425 = vmatpush1.bf16.msra.mxu1 %v1642_v47  ;;  %v1687_v47 = vld [vmem:[%s2446_s5 + $0x15c] ss:$28 sps:$4 sm:$0xff]  }
  0x3f   :  { %426 = vmatprep.subr.bf16.mxu1 %v1643_v48  ;;  %1201 = vmatpush1.bf16.msra.mxu0 %v1688_v2  ;;  %v1685_v48 = vld [vmem:[%s2446_s5 + $0x158] ss:$28 sps:$4 sm:$0xff]  }
  0x40   :  { %1202 = vmatprep.subr.bf16.mxu0 %v1696_v3  ;;  %v1733_v2 = vld [vmem:[%s2446_s5 + $0x318] ss:$28 sps:$4 sm:$0xff]   ;;  %v1738_v3 = vld [vmem:[%s2446_s5 + $0x34c] ss:$28 sps:$4 sm:$0xff]  }
  0x42   :  { %427 = vmatpush1.bf16.msra.mxu1 %v1645_v49  ;;  %v1693_v49 = vld [vmem:[%s2446_s5 + $0x194] ss:$28 sps:$4 sm:$0xff]  }
  0x43   :  { %1229 = vmatprep.subr.bf16.mxu1 %v1651_v52  ;;  %1203 = vmatpush1.bf16.msra.mxu0 %v1694_v4  ;;  %v1697_v52 = vld [vmem:[%s2446_s5 + $0x1c8] ss:$28 sps:$4 sm:$0xff]   ;;  %v1741_v4 = vld [vmem:[%s2446_s5 + $0x354] ss:$28 sps:$4 sm:$0xff]  }
  0x44   :  { %1204 = vmatprep.subr.bf16.mxu0 %v1702_v5  ;;  %v1736_v5 = vld [vmem:[%s2446_s5 + $0x348] ss:$28 sps:$4 sm:$0xff]  }
  0x47   :  { %1205 = vmatpush1.bf16.msra.mxu0 %v1700_v6  ;;  %v1739_v6 = vld [vmem:[%s2446_s5 + $0x350] ss:$28 sps:$4 sm:$0xff]  }
  0x48   :  { %1206 = vmatprep.subr.bf16.mxu0 %v1708_v7  ;;  %v1744_v7 = vld [vmem:[%s2446_s5 + $0x14] ss:$28 sps:$4 sm:$0xff]  }
  0x4b   :  { %1207 = vmatpush1.bf16.msra.mxu0 %v1706_v8  ;;  %v1745_v8 = vld [vmem:[%s2446_s5 + $0x1d8] ss:$28 sps:$4 sm:$0xff]  }
  0x4c   :  { %1208 = vmatprep.subr.bf16.mxu0 %v1714_v9  ;;  %v224_v9 = vld [vmem:[%s2448_s4] sm:$0x3] }
  0x4f   :  { %1209 = vmatpush1.bf16.msra.mxu0 %v1712_v10  ;;  %v229_v10 = vrot.slane %v224_v9, %v2112_v17 }
  0x50   :  { %1210 = vmatprep.subr.bf16.mxu0 %v1720_v11  ;;  %v233_v11 = vrot.slane %v224_v9, %v2118_v19  ;;  %v1805_v9 = vld [vmem:[%s2446_s5 + $0x35c] ss:$28 sps:$4 sm:$0xff]  }
  0x53   :  { %1211 = vmatpush1.bf16.msra.mxu0 %v1718_v12 }
  0x54   :  { %1212 = vmatprep.subr.bf16.mxu0 %v1726_v13 }
  0x57   :  { %1213 = vmatpush1.bf16.msra.mxu0 %v1724_v14 }
  0x58   :  { %1214 = vmatprep.subr.bf16.mxu0 %v1732_v63  ;;  %v1790_v63 = vld [vmem:[%s2446_s5 + $0x244] ss:$28 sps:$4 sm:$0xff]  }
  0x5b   :  { %1215 = vmatpush1.bf16.msra.mxu0 %v1730_v1  ;;  %v1793_v1 = vld [vmem:[%s2446_s5 + $0x27c] ss:$28 sps:$4 sm:$0xff]  }
  0x5c   :  { %1216 = vmatprep.subr.bf16.mxu0 %v1738_v3  ;;  %v1796_v3 = vld [vmem:[%s2446_s5 + $0x2b4] ss:$28 sps:$4 sm:$0xff]  }
  0x5f   :  { %1217 = vmatpush1.bf16.msra.mxu0 %v1736_v5  ;;  %v1799_v5 = vld [vmem:[%s2446_s5 + $0x2ec] ss:$28 sps:$4 sm:$0xff]  }
  0x60   :  { %1272 = vmatprep.subr.bf16.mxu0 %v1744_v7  ;;  %v1802_v7 = vld [vmem:[%s2446_s5 + $0x324] ss:$28 sps:$4 sm:$0xff]  }
  0xf5   :  { %v177_v22 = vpop.f32.mrb[0].mxu0 }
  0xf6   :  { %v178_v23 = vadd.f32 %v177_v22, %v50_v20  ;;  %v179_v24 = vpop.f32.mrb[1].mxu0 }
  0xf7   :  { %v180_v25 = vadd.f32 %v179_v24, %v54_v21  ;;  %v181_v26 = vpop.f32.mrb[2].mxu0 }
  0xf8   :  { %v182_v27 = vadd.f32 %v181_v26, %v50_v20  ;;  %v183_v28 = vpop.f32.mrb[3].mxu0  ;;  %v186_v30 = vmax.f32 %v178_v23, 0.0 }
  0xf9   :  { %v184_v29 = vadd.f32 %v183_v28, %v54_v21  ;;  %v187_v32 = vmax.f32 %v180_v25, 0.0 }
  0xfa   :  { %v188_v31 = vmax.f32 %v182_v27, 0.0 }
  0xfb   :  { %v189_v33 = vmax.f32 %v184_v29, 0.0  ;;  %v1742_v29 = vld [vmem:[%s2446_s5 + $0x10] ss:$28 sps:$4 sm:$0xff]  }
  0xfc   :  { %v190_v34 = vpack.c.bf16 %v188_v31, %v186_v30  ;;  %v1746_v30 = vld [vmem:[%s2446_s5 + $0x18] ss:$28 sps:$4 sm:$0xff]   ;;  %v1749_v31 = vld [vmem:[%s2446_s5 + $0x4c] ss:$28 sps:$4 sm:$0xff]  }
  0xfd   :  { %v191_v35 = vpack.c.bf16 %v189_v33, %v187_v32  ;;  %v1750_v32 = vld [vmem:[%s2446_s5 + $0x210] ss:$28 sps:$4 sm:$0xff]   ;;  %v1747_v33 = vld [vmem:[%s2446_s5 + $0x48] ss:$28 sps:$4 sm:$0xff]  }
  0xff   :  { %428 = vmatprep.mubr.bf16.mxu1 %v191_v35  ;;  %v1754_v35 = vld [vmem:[%s2446_s5 + $0x84] ss:$28 sps:$4 sm:$0xff]  }
 0x100   :  { %429 = vmatmul.mubr.bf16.vlgmr.msra.gmra.mrb[0].mxu1 %v190_v34  ;;  %v1751_v34 = vld [vmem:[%s2446_s5 + $0x50] ss:$28 sps:$4 sm:$0xff]  }
 0x101   :  { %1230 = vmatpush1.bf16.msra.mxu1 %v1649_v36  ;;  %v1755_v36 = vld [vmem:[%s2446_s5 + $0x248] ss:$28 sps:$4 sm:$0xff]  }
 0x102   :  { %1231 = vmatprep.subr.bf16.mxu1 %v1657_v37  ;;  %v1752_v37 = vld [vmem:[%s2446_s5 + $0x80] ss:$28 sps:$4 sm:$0xff]  }
 0x105   :  { %1232 = vmatpush1.bf16.msra.mxu1 %v1655_v38  ;;  %v1756_v38 = vld [vmem:[%s2446_s5 + $0x88] ss:$28 sps:$4 sm:$0xff]  }
 0x106   :  { %1233 = vmatprep.subr.bf16.mxu1 %v1663_v39  ;;  %v1759_v39 = vld [vmem:[%s2446_s5 + $0xbc] ss:$28 sps:$4 sm:$0xff]  }
 0x109   :  { %1234 = vmatpush1.bf16.msra.mxu1 %v1661_v40  ;;  %v1760_v40 = vld [vmem:[%s2446_s5 + $0x280] ss:$28 sps:$4 sm:$0xff]  }
 0x10a   :  { %1235 = vmatprep.subr.bf16.mxu1 %v1669_v41  ;;  %v1757_v41 = vld [vmem:[%s2446_s5 + $0xb8] ss:$28 sps:$4 sm:$0xff]  }
 0x10d   :  { %1236 = vmatpush1.bf16.msra.mxu1 %v1667_v42  ;;  %v1761_v42 = vld [vmem:[%s2446_s5 + $0xc0] ss:$28 sps:$4 sm:$0xff]  }
 0x10e   :  { %1237 = vmatprep.subr.bf16.mxu1 %v1675_v43  ;;  %v1764_v43 = vld [vmem:[%s2446_s5 + $0xf4] ss:$28 sps:$4 sm:$0xff]  }
 0x111   :  { %1238 = vmatpush1.bf16.msra.mxu1 %v1673_v44  ;;  %v1765_v44 = vld [vmem:[%s2446_s5 + $0x2b8] ss:$28 sps:$4 sm:$0xff]  }
 0x112   :  { %1239 = vmatprep.subr.bf16.mxu1 %v1681_v45  ;;  %v1762_v45 = vld [vmem:[%s2446_s5 + $0xf0] ss:$28 sps:$4 sm:$0xff]  }
 0x115   :  { %1240 = vmatpush1.bf16.msra.mxu1 %v1679_v46  ;;  %v1766_v46 = vld [vmem:[%s2446_s5 + $0xf8] ss:$28 sps:$4 sm:$0xff]  }
 0x116   :  { %1241 = vmatprep.subr.bf16.mxu1 %v1687_v47  ;;  %v1769_v47 = vld [vmem:[%s2446_s5 + $0x12c] ss:$28 sps:$4 sm:$0xff]  }
 0x119   :  { %1242 = vmatpush1.bf16.msra.mxu1 %v1685_v48  ;;  %v1770_v48 = vld [vmem:[%s2446_s5 + $0x2f0] ss:$28 sps:$4 sm:$0xff]  }
 0x11a   :  { %1243 = vmatprep.subr.bf16.mxu1 %v1693_v49  ;;  %v1767_v49 = vld [vmem:[%s2446_s5 + $0x128] ss:$28 sps:$4 sm:$0xff]  }
 0x11d   :  { %1244 = vmatpush1.bf16.msra.mxu1 %v1691_v50  ;;  %v1771_v50 = vld [vmem:[%s2446_s5 + $0x130] ss:$28 sps:$4 sm:$0xff]  }
 0x11e   :  { %1245 = vmatprep.subr.bf16.mxu1 %v1699_v51  ;;  %v1774_v51 = vld [vmem:[%s2446_s5 + $0x164] ss:$28 sps:$4 sm:$0xff]  }
 0x121   :  { %1246 = vmatpush1.bf16.msra.mxu1 %v1697_v52  ;;  %v1775_v52 = vld [vmem:[%s2446_s5 + $0x328] ss:$28 sps:$4 sm:$0xff]  }
 0x122   :  { %1247 = vmatprep.subr.bf16.mxu1 %v1705_v53  ;;  %v1772_v53 = vld [vmem:[%s2446_s5 + $0x160] ss:$28 sps:$4 sm:$0xff]  }
 0x125   :  { %1248 = vmatpush1.bf16.msra.mxu1 %v1703_v54  ;;  %v1776_v54 = vld [vmem:[%s2446_s5 + $0x168] ss:$28 sps:$4 sm:$0xff]  }
 0x126   :  { %1249 = vmatprep.subr.bf16.mxu1 %v1711_v55  ;;  %v1779_v55 = vld [vmem:[%s2446_s5 + $0x19c] ss:$28 sps:$4 sm:$0xff]  }
 0x129   :  { %1250 = vmatpush1.bf16.msra.mxu1 %v1709_v56  ;;  %v1780_v56 = vld [vmem:[%s2446_s5 + $0x360] ss:$28 sps:$4 sm:$0xff]  }
 0x12a   :  { %1251 = vmatprep.subr.bf16.mxu1 %v1717_v57  ;;  %v1777_v57 = vld [vmem:[%s2446_s5 + $0x198] ss:$28 sps:$4 sm:$0xff]  }
 0x12d   :  { %1252 = vmatpush1.bf16.msra.mxu1 %v1715_v58  ;;  %v1781_v58 = vld [vmem:[%s2446_s5 + $0x1a0] ss:$28 sps:$4 sm:$0xff]  }
 0x12e   :  { %1253 = vmatprep.subr.bf16.mxu1 %v1723_v59  ;;  %v1784_v59 = vld [vmem:[%s2446_s5 + $0x1d4] ss:$28 sps:$4 sm:$0xff]  }
 0x131   :  { %1254 = vmatpush1.bf16.msra.mxu1 %v1721_v60  ;;  %v1782_v60 = vld [vmem:[%s2446_s5 + $0x1d0] ss:$28 sps:$4 sm:$0xff]  }
 0x132   :  { %1255 = vmatprep.subr.bf16.mxu1 %v1729_v61  ;;  %v1787_v61 = vld [vmem:[%s2446_s5 + $0x20c] ss:$28 sps:$4 sm:$0xff]  }
 0x135   :  { %1256 = vmatpush1.bf16.msra.mxu1 %v1727_v62  ;;  %v1785_v62 = vld [vmem:[%s2446_s5 + $0x208] ss:$28 sps:$4 sm:$0xff]  }
 0x136   :  { %1257 = vmatprep.subr.bf16.mxu1 %v1735_v0  ;;  %v1788_v0 = vld [vmem:[%s2446_s5 + $0x240] ss:$28 sps:$4 sm:$0xff]  }
 0x139   :  { %1258 = vmatpush1.bf16.msra.mxu1 %v1733_v2  ;;  %v1791_v2 = vld [vmem:[%s2446_s5 + $0x278] ss:$28 sps:$4 sm:$0xff]  }
 0x13a   :  { %1259 = vmatprep.subr.bf16.mxu1 %v1741_v4  ;;  %v1794_v4 = vld [vmem:[%s2446_s5 + $0x2b0] ss:$28 sps:$4 sm:$0xff]  }
 0x13d   :  { %1260 = vmatpush1.bf16.msra.mxu1 %v1739_v6  ;;  %v1797_v6 = vld [vmem:[%s2446_s5 + $0x2e8] ss:$28 sps:$4 sm:$0xff]  }
 0x13e   :  { %1550 = vmatprep.subr.bf16.mxu1 %v1745_v8  ;;  %v1800_v8 = vld [vmem:[%s2446_s5 + $0x320] ss:$28 sps:$4 sm:$0xff]  }
 0x1d3   :  { %v430_v12 = vpop.f32.mrb[0].mxu1 }
 0x1d4   :  { %v431_v13 = vadd.f32 %v430_v12, %v229_v10  ;;  %v432_v14 = vpop.f32.mrb[1].mxu1  ;;  %v2386_v12 = vld [vmem:[%s2449_s6] sm:$0x7f] }
 0x1d5   :  { %v433_v15 = vadd.f32 %v432_v14, %v233_v11  ;;  %v434_v18 = vpop.f32.mrb[2].mxu1  ;;  %v578_v14 = vrot.slane %v2386_v12, %v2112_v17 }
 0x1d6   :  { %v435_v20 = vadd.f32 %v434_v18, %v229_v10  ;;  %v436_v21 = vpop.f32.mrb[3].mxu1  ;;  %v439_v23 = vmax.f32 %v431_v13, 0.0  ;;  %v1803_v10 = vld [vmem:[%s2446_s5 + $0x358] ss:$28 sps:$4 sm:$0xff]   ;;  %v589_v13 = vsub.s32 3, %v2109_v16  ;;  %v582_v18 = vrot.slane %v2386_v12, %v2118_v19 }
 0x1d7   :  { %v437_v22 = vadd.f32 %v436_v21, %v233_v11  ;;  %v440_v25 = vmax.f32 %v433_v15, 0.0  ;;  %v585_v11 = vsub.s32 2, %v2109_v16 }
 0x1d8   :  { %v441_v24 = vmax.f32 %v435_v20, 0.0  ;;  %v590_v20 = vrot.slane %v2386_v12, %v589_v13 }
 0x1d9   :  { %v442_v26 = vmax.f32 %v437_v22, 0.0  ;;  %v586_v15 = vrot.slane %v2386_v12, %v585_v11 }
 0x1da   :  { %v2238_v27 = vpack.c.bf16 %v441_v24, %v439_v23 }
 0x1db   :  { %v444_v28 = vpack.c.bf16 %v442_v26, %v440_v25 }
 0x1dd   :  { %1218 = vmatprep.mubr.bf16.mxu0 %v444_v28  ;;  %1261 = vmatprep.mubr.bf16.mxu1 %v444_v28 }
 0x1de   :  { %1219 = vmatmul.mubr.bf16.vlgmr.msra.gmra.mrb[4].mxu0 %v2238_v27  ;;  %1262 = vmatmul.mubr.bf16.vlgmr.msra.gmra.mrb[4].mxu1 %v2238_v27 }
 0x1df   :  { %1273 = vmatpush1.bf16.msra.mxu0 %v1742_v29  ;;  %1551 = vmatpush3.bf16.msra.mxu1 %v1746_v30 }
 0x1e0   :  { %1304 = vmatprep.mubr.bf16.mxu0 %v444_v28  ;;  %1347 = vmatprep.mubr.bf16.mxu1 %v444_v28 }
 0x1e1   :  { %1274 = vmatprep.subr.bf16.mxu0 %v1749_v31  ;;  %1552 = vmatprep.subr.bf16.mxu1 %v1750_v32 }
 0x1e3   :  { %1275 = vmatpush1.bf16.msra.mxu0 %v1747_v33  ;;  %1553 = vmatpush3.bf16.msra.mxu1 %v1751_v34 }
 0x1e4   :  { %1276 = vmatprep.subr.bf16.mxu0 %v1754_v35  ;;  %1554 = vmatprep.subr.bf16.mxu1 %v1755_v36 }
 0x1e7   :  { %1277 = vmatpush1.bf16.msra.mxu0 %v1752_v37  ;;  %1555 = vmatpush3.bf16.msra.mxu1 %v1756_v38 }
 0x1e8   :  { %1278 = vmatprep.subr.bf16.mxu0 %v1759_v39  ;;  %1556 = vmatprep.subr.bf16.mxu1 %v1760_v40 }
 0x1eb   :  { %1279 = vmatpush1.bf16.msra.mxu0 %v1757_v41  ;;  %1557 = vmatpush3.bf16.msra.mxu1 %v1761_v42 }
 0x1ec   :  { %1280 = vmatprep.subr.bf16.mxu0 %v1764_v43  ;;  %1558 = vmatprep.subr.bf16.mxu1 %v1765_v44  ;;  %v601_v43 = vsub.s32 6, %v2109_v16 }
 0x1ef   :  { %1281 = vmatpush1.bf16.msra.mxu0 %v1762_v45  ;;  %1559 = vmatpush3.bf16.msra.mxu1 %v1766_v46  ;;  %v602_v45 = vrot.slane %v2386_v12, %v601_v43 }
 0x1f0   :  { %1282 = vmatprep.subr.bf16.mxu0 %v1769_v47  ;;  %1560 = vmatprep.subr.bf16.mxu1 %v1770_v48 }
 0x1f3   :  { %1283 = vmatpush1.bf16.msra.mxu0 %v1767_v49  ;;  %1561 = vmatpush3.bf16.msra.mxu1 %v1771_v50 }
 0x1f4   :  { %1284 = vmatprep.subr.bf16.mxu0 %v1774_v51  ;;  %1562 = vmatprep.subr.bf16.mxu1 %v1775_v52 }
 0x1f7   :  { %1285 = vmatpush1.bf16.msra.mxu0 %v1772_v53  ;;  %1563 = vmatpush3.bf16.msra.mxu1 %v1776_v54 }
 0x1f8   :  { %1286 = vmatprep.subr.bf16.mxu0 %v1779_v55  ;;  %1564 = vmatprep.subr.bf16.mxu1 %v1780_v56  ;;  %v593_v55 = vsub.s32 4, %v2109_v16  ;;  %v597_v56 = vsub.s32 5, %v2109_v16 }
 0x1fb   :  { %1287 = vmatpush1.bf16.msra.mxu0 %v1777_v57  ;;  %1565 = vmatpush3.bf16.msra.mxu1 %v1781_v58  ;;  %v594_v57 = vrot.slane %v2386_v12, %v593_v55  ;;  %v598_v58 = vrot.slane %v2386_v12, %v597_v56 }
 0x1fc   :  { %1288 = vmatprep.subr.bf16.mxu0 %v1784_v59 }
 0x1fe   :  { %1348 = vmatmul.mubr.bf16.vlgmr.msra.gmra.mrb[8].mxu1 %v2238_v27 }
 0x1ff   :  { %1289 = vmatpush1.bf16.msra.mxu0 %v1782_v60 }
 0x200   :  { %1290 = vmatprep.subr.bf16.mxu0 %v1787_v61 }
 0x203   :  { %1291 = vmatpush1.bf16.msra.mxu0 %v1785_v62 }
 0x204   :  { %1292 = vmatprep.subr.bf16.mxu0 %v1790_v63 }
 0x207   :  { %1293 = vmatpush1.bf16.msra.mxu0 %v1788_v0 }
 0x208   :  { %1294 = vmatprep.subr.bf16.mxu0 %v1793_v1 }
 0x20b   :  { %1295 = vmatpush1.bf16.msra.mxu0 %v1791_v2 }
 0x20c   :  { %1296 = vmatprep.subr.bf16.mxu0 %v1796_v3 }
 0x20f   :  { %1297 = vmatpush1.bf16.msra.mxu0 %v1794_v4 }
 0x210   :  { %1298 = vmatprep.subr.bf16.mxu0 %v1799_v5 }
 0x213   :  { %1299 = vmatpush1.bf16.msra.mxu0 %v1797_v6 }
 0x214   :  { %1300 = vmatprep.subr.bf16.mxu0 %v1802_v7 }
 0x217   :  { %1301 = vmatpush1.bf16.msra.mxu0 %v1800_v8 }
 0x218   :  { %1302 = vmatprep.subr.bf16.mxu0 %v1805_v9 }
 0x21b   :  { %1303 = vmatpush1.bf16.msra.mxu0 %v1803_v10 }
 0x21e   :  { %1305 = vmatmul.mubr.bf16.vlgmr.msra.gmra.mrb[8].mxu0 %v2238_v27 }
 0x2b1   :  { %v1220_v21 = vpop.f32.mrb[4].mxu0  ;;  %v1263_v22 = vpop.f32.mrb[4].mxu1 }
 0x2b2   :  { %v1221_v23 = vadd.f32 %v1220_v21, %v578_v14  ;;  %v1264_v24 = vadd.f32 %v1263_v22, %v586_v15  ;;  %v1222_v25 = vpop.f32.mrb[5].mxu0  ;;  %v1265_v26 = vpop.f32.mrb[5].mxu1 }
 0x2b3   :  { %v1223_v27 = vadd.f32 %v1222_v25, %v582_v18  ;;  %v1266_v28 = vadd.f32 %v1265_v26, %v590_v20  ;;  %v1224_v29 = vpop.f32.mrb[6].mxu0  ;;  %v1267_v30 = vpop.f32.mrb[6].mxu1 }
 0x2b4   :  { %1806 = vtanh.f32 %v1221_v23  ;;  %v1225_v31 = vadd.f32 %v1224_v29, %v578_v14  ;;  %v1226_v17 = vpop.f32.mrb[7].mxu0  ;;  %v1269_v32 = vpop.f32.mrb[7].mxu1  ;;  %v1268_v33 = vadd.f32 %v1267_v30, %v586_v15 }
 0x2b5   :  { %1808 = vtanh.f32 %v1264_v24  ;;  %v1227_v19 = vadd.f32 %v1226_v17, %v582_v18  ;;  %v1270_v34 = vadd.f32 %v1269_v32, %v590_v20 }
 0x2b6   :  { %1810 = vtanh.f32 %v1223_v27 }
 0x2b7   :  { %1812 = vtanh.f32 %v1266_v28 }
 0x2b8   :  { %1814 = vtanh.f32 %v1225_v31 }
 0x2b9   :  { %1816 = vtanh.f32 %v1268_v33 }
 0x2ba   :  { %1818 = vtanh.f32 %v1227_v19 }
 0x2bb   :  { %1820 = vtanh.f32 %v1270_v34 }
 0x2be   :  { %v1807_v35 = vpop.eup %1806 }
 0x2bf   :  { %v1809_v36 = vpop.eup %1808  ;;  %1370 = vst [vmem:[%s2450_s7] sm:$0xff] %v1807_v35 }
 0x2c0   :  { %v1811_v37 = vpop.eup %1810  ;;  %1372 = vst [vmem:[%s2450_s7 + $0x10] sm:$0xff] %v1809_v36 }
 0x2c1   :  { %v1813_v38 = vpop.eup %1812  ;;  %1371 = vst [vmem:[%s2450_s7 + $0x8] sm:$0xff] %v1811_v37 }
 0x2c2   :  { %v1815_v39 = vpop.eup %1814  ;;  %1373 = vst [vmem:[%s2450_s7 + $0x18] sm:$0xff] %v1813_v38 }
 0x2c3   :  { %v1817_v40 = vpop.eup %1816  ;;  %1378 = vst [vmem:[%s2450_s7 + $0x38] sm:$0xff] %v1815_v39 }
 0x2c4   :  { %v1819_v41 = vpop.eup %1818  ;;  %1380 = vst [vmem:[%s2450_s7 + $0x48] sm:$0xff] %v1817_v40 }
 0x2c5   :  { %v1821_v42 = vpop.eup %1820  ;;  %1379 = vst [vmem:[%s2450_s7 + $0x40] sm:$0xff] %v1819_v41 }
 0x2c6   :  { %1381 = vst [vmem:[%s2450_s7 + $0x50] sm:$0xff] %v1821_v42 }
 0x2d1   :  { %v1566_v44 = vpop.f32.mrb[8].mxu1 }
 0x2d2   :  { %v1567_v46 = vpop.f32.mrb[9].mxu1 }
 0x2d3   :  { %v1568_v47 = vadd.f32 %v1567_v46, %v1566_v44  ;;  %v1569_v48 = vpop.f32.mrb[10].mxu1 }
 0x2d4   :  { %v1570_v49 = vpop.f32.mrb[11].mxu1 }
 0x2d5   :  { %v1350_v50 = vadd.f32 %v1568_v47, %v602_v45  ;;  %v1571_v51 = vadd.f32 %v1570_v49, %v1569_v48 }
 0x2d7   :  { %1822 = vtanh.f32 %v1350_v50  ;;  %v1353_v52 = vadd.f32 %v1571_v51, %v602_v45 }
 0x2d9   :  { %1824 = vtanh.f32 %v1353_v52 }
 0x2e1   :  { %v1823_v53 = vpop.eup %1822 }
 0x2e2   :  { %1377 = vst.msk [vmem:[%s2450_s7 + $0x30] sm:$0xff] %vm1376_vm0, %v1823_v53 }
 0x2e3   :  { %v1825_v54 = vpop.eup %1824 }
 0x2e4   :  { %1384 = vst.msk [vmem:[%s2450_s7 + $0x68] sm:$0xff] %vm1376_vm0, %v1825_v54 }
 0x2f1   :  { %v1306_v59 = vpop.f32.mrb[8].mxu0 }
 0x2f2   :  { %v1307_v60 = vadd.f32 %v1306_v59, %v594_v57  ;;  %v1308_v61 = vpop.f32.mrb[9].mxu0 }
 0x2f3   :  { %v1309_v62 = vadd.f32 %v1308_v61, %v598_v58  ;;  %v1310_v63 = vpop.f32.mrb[10].mxu0 }
 0x2f4   :  { %1826 = vtanh.f32 %v1307_v60  ;;  %v1311_v0 = vadd.f32 %v1310_v63, %v594_v57  ;;  %v1312_v1 = vpop.f32.mrb[11].mxu0 }
 0x2f5   :  { %1828 = vtanh.f32 %v1309_v62  ;;  %v1313_v2 = vadd.f32 %v1312_v1, %v598_v58 }
 0x2f6   :  { %1830 = vtanh.f32 %v1311_v0 }
 0x2f7   :  { %1832 = vtanh.f32 %v1313_v2 }
 0x2fe   :  { %v1827_v3 = vpop.eup %1826 }
 0x2ff   :  { %v1829_v4 = vpop.eup %1828  ;;  %1374 = vst [vmem:[%s2450_s7 + $0x20] sm:$0xff] %v1827_v3 }
 0x300   :  { %v1831_v16 = vpop.eup %1830  ;;  %1375 = vst [vmem:[%s2450_s7 + $0x28] sm:$0xff] %v1829_v4 }
 0x301   :  { %v1833_v5 = vpop.eup %1832  ;;  %1382 = vst [vmem:[%s2450_s7 + $0x58] sm:$0xff] %v1831_v16 }
 0x302   :  { %1383 = vst [vmem:[%s2450_s7 + $0x60] sm:$0xff] %v1833_v5 }

</bundles_post_ra>
